<compile_context>
chip_gen: v5e
topology: v5e:2x2
jax: 0.10.0
libtpu: 0.0.40
codegen_flags: <defaults>
</compile_context>

<pallas_src>
import jax
import jax.numpy as jnp
from jax.experimental import pallas as pl
from jax.experimental.pallas import tpu as pltpu

# ----------------------------- problem sizes ---------------------------------
BATCH = 2            # batch_size
D_VAR = 12           # data_variable_size (nodes in origin_A)
N_IN_Z = 8           # n_in_z
N_HID = 16           # n_hid
N_OUT = 8            # n_out
N_IN_NODE = 8        # n_in_node (unused by the reference forward)

FPAD = 128                               # lane (feature) padding
ROWS = BATCH * D_VAR                     # flattened (batch, node) rows = 24
R_PAD = ((ROWS + 7) // 8) * 8            # sublane padding (multiple of 8) = 32


# ------------------------------ Pallas kernel --------------------------------
def mlp_decoder_kernel(adj_ref, z_ref, wa_ref, w1_ref, b1_ref, w2_ref, b2_ref,
                       matz_ref, out_ref):
    """mat_z = adj_bd @ (z + Wa) - Wa ; out = fc2(relu(fc1(mat_z))). One pass,
    three lane-dense MXU matmuls, f32 throughout."""
    wa = wa_ref[...]                                             # (1, FPAD)
    zin = z_ref[...] + wa                                        # (R_PAD, FPAD)
    matz = jnp.dot(adj_ref[...], zin,
                   preferred_element_type=jnp.float32) - wa      # (R_PAD, FPAD)
    matz_ref[...] = matz

    # fc1 + ReLU
    h = jnp.dot(matz, w1_ref[...],
                preferred_element_type=jnp.float32) + b1_ref[...]
    h = jnp.maximum(h, 0.0)

    # fc2
    out_ref[...] = jnp.dot(h, w2_ref[...],
                           preferred_element_type=jnp.float32) + b2_ref[...]


# ------------------------------- helpers --------------------------------------
def _pad2(x, rows, cols, dtype=jnp.float32):
    out = jnp.zeros((rows, cols), dtype)
    return out.at[: x.shape[0], : x.shape[1]].set(x.astype(dtype))


def build_params(key):
    """nn.Linear weights: xavier_normal_, biases zero (init_weights)."""
    k1, k2 = jax.random.split(key)
    std1 = (2.0 / (N_IN_Z + N_HID)) ** 0.5
    std2 = (2.0 / (N_HID + N_OUT)) ** 0.5
    w1 = std1 * jax.random.normal(k1, (N_IN_Z, N_HID), jnp.float32)   # x @ W layout
    w2 = std2 * jax.random.normal(k2, (N_HID, N_OUT), jnp.float32)
    return dict(w1=w1, b1=jnp.zeros((N_HID,), jnp.float32),
                w2=w2, b2=jnp.zeros((N_OUT,), jnp.float32))


# ------------------------------- wrapper --------------------------------------
def mlp_decoder_forward(params, inputs, input_z, n_in_node, rel_rec, rel_send,
                        origin_A, adj_A_tilt, Wa):
    """Mirrors MLPDecoder.forward; inputs/rel_rec/rel_send/n_in_node are unused
    by the reference forward and accepted only for signature fidelity."""
    del inputs, n_in_node, rel_rec, rel_send
    B, d, zdim = input_z.shape
    rows = B * d
    assert rows <= R_PAD and zdim <= FPAD

    # preprocess_adj_new1: inverse(I - A^T)  (wrapper-side; float32 on TPU)
    adj_inv = jnp.linalg.inv(
        jnp.eye(d, dtype=jnp.float32) - origin_A.T.astype(jnp.float32))
    # block-diagonal copies per batch -> the batched node contraction is ONE matmul
    adj_bd = jnp.kron(jnp.eye(B, dtype=jnp.float32), adj_inv)          # (rows, rows)

    adj_pad = _pad2(adj_bd, R_PAD, R_PAD)                              # (32, 32)
    z_pad = _pad2(input_z.reshape(rows, zdim), R_PAD, FPAD)            # (32, 128)
    wa_pad = _pad2(Wa.reshape(1, zdim), 1, FPAD)
    w1_pad = _pad2(params["w1"], FPAD, FPAD)
    b1_pad = _pad2(params["b1"].reshape(1, -1), 1, FPAD)
    w2_pad = _pad2(params["w2"], FPAD, FPAD)
    b2_pad = _pad2(params["b2"].reshape(1, -1), 1, FPAD)

    def full(r, c):
        return pl.BlockSpec((r, c), lambda i: (0, 0))

    matz_p, out_p = pl.pallas_call(
        mlp_decoder_kernel,
        out_shape=(jax.ShapeDtypeStruct((R_PAD, FPAD), jnp.float32),
                   jax.ShapeDtypeStruct((R_PAD, FPAD), jnp.float32)),
        grid_spec=pltpu.PrefetchScalarGridSpec(
            num_scalar_prefetch=0,
            grid=(1,),
            in_specs=[full(R_PAD, R_PAD),      # adj (block-diag, small K pad)
                      full(R_PAD, FPAD),       # z
                      full(1, FPAD),           # Wa
                      full(FPAD, FPAD),        # W1
                      full(1, FPAD),           # b1
                      full(FPAD, FPAD),        # W2
                      full(1, FPAD)],          # b2
            out_specs=[full(R_PAD, FPAD), full(R_PAD, FPAD)],
        ),
        compiler_params=pltpu.CompilerParams(
            dimension_semantics=("arbitrary",)),
    )(adj_pad, z_pad, wa_pad, w1_pad, b1_pad, w2_pad, b2_pad)

    # single slices (no per-sample Python loops)
    mat_z = matz_p[:rows, :zdim].reshape(B, d, zdim)
    out = out_p[:rows, :N_OUT].reshape(B, d, N_OUT)
    return mat_z, out, adj_A_tilt


# --------------------------- pure-JAX reference -------------------------------
def mlp_decoder_ref(params, input_z, origin_A, Wa):
    d = origin_A.shape[0]
    adj_inv = jnp.linalg.inv(
        jnp.eye(d, dtype=jnp.float32) - origin_A.T.astype(jnp.float32))
    mat_z = jnp.einsum("ij,bjk->bik", adj_inv, input_z + Wa,
                       precision=jax.lax.Precision.HIGHEST) - Wa
    h = jnp.maximum(
        jnp.dot(mat_z, params["w1"],
                precision=jax.lax.Precision.HIGHEST) + params["b1"], 0.0)
    out = jnp.dot(h, params["w2"],
                  precision=jax.lax.Precision.HIGHEST) + params["b2"]
    return mat_z, out


# --------------------------------- main ----------------------------------------
if __name__ == "__main__":
    key = jax.random.PRNGKey(0)
    kp, kz, ka, kt, kw, kx = jax.random.split(key, 6)

    params = build_params(kp)
    input_z = jax.random.normal(kz, (BATCH, D_VAR, N_IN_Z), jnp.float32)
    origin_A = 0.1 * jax.random.normal(ka, (D_VAR, D_VAR), jnp.float32)
    adj_A_tilt = jax.random.normal(kt, (D_VAR, D_VAR), jnp.float32)
    Wa = 0.1 * jax.random.normal(kw, (N_IN_Z,), jnp.float32)
    inputs = jax.random.normal(kx, (BATCH, D_VAR, N_IN_NODE), jnp.float32)
    rel_rec = rel_send = None   # unused by the reference forward

    mat_z, out, adj_tilt_out = mlp_decoder_forward(
        params, inputs, input_z, N_IN_NODE, rel_rec, rel_send,
        origin_A, adj_A_tilt, Wa)
    jax.block_until_ready(mat_z)
    jax.block_until_ready(out)

    matz_ref, out_ref = mlp_decoder_ref(params, input_z, origin_A, Wa)

    assert mat_z.shape == (BATCH, D_VAR, N_IN_Z)
    assert out.shape == (BATCH, D_VAR, N_OUT)
    assert adj_tilt_out.shape == (D_VAR, D_VAR)
    assert bool(jnp.all(jnp.isfinite(mat_z))) and bool(jnp.all(jnp.isfinite(out)))
    assert float(jnp.max(jnp.abs(mat_z - matz_ref))) < 2e-2
    assert float(jnp.max(jnp.abs(out - out_ref))) < 2e-2

    print("KERNEL_OK")
</pallas_src>

<mosaic_0001>
module attributes {stable_mosaic.version = 11 : i64} {
  func.func @mlp_decoder_kernel(%arg0: i32, %arg1: memref<24x24xf32, #tpu.memory_space<vmem>>, %arg2: memref<24x128xf32, #tpu.memory_space<vmem>>, %arg3: memref<1x128xf32, #tpu.memory_space<vmem>>, %arg4: memref<128x128xf32, #tpu.memory_space<vmem>>, %arg5: memref<1x128xf32, #tpu.memory_space<vmem>>, %arg6: memref<128x128xf32, #tpu.memory_space<vmem>>, %arg7: memref<1x128xf32, #tpu.memory_space<vmem>>, %arg8: memref<24x128xf32, #tpu.memory_space<vmem>>, %arg9: memref<24x128xf32, #tpu.memory_space<vmem>>) attributes {dimension_semantics = [#tpu.dimension_semantics<arbitrary>], iteration_bounds = array<i64: 1>, scalar_prefetch = 0 : i64, scratch_operands = 0 : i64, tpu.core_type = #tpu.core_type<tc>, window_params = [{pipeline_mode = #tpu.pipeline_mode<synchronous>, transform_indices = @transform_0, window_bounds = array<i64: 24, 24>}, {pipeline_mode = #tpu.pipeline_mode<synchronous>, transform_indices = @transform_1, window_bounds = array<i64: 24, 128>}, {pipeline_mode = #tpu.pipeline_mode<synchronous>, transform_indices = @transform_2, window_bounds = array<i64: 1, 128>}, {pipeline_mode = #tpu.pipeline_mode<synchronous>, transform_indices = @transform_3, window_bounds = array<i64: 128, 128>}, {pipeline_mode = #tpu.pipeline_mode<synchronous>, transform_indices = @transform_4, window_bounds = array<i64: 1, 128>}, {pipeline_mode = #tpu.pipeline_mode<synchronous>, transform_indices = @transform_5, window_bounds = array<i64: 128, 128>}, {pipeline_mode = #tpu.pipeline_mode<synchronous>, transform_indices = @transform_6, window_bounds = array<i64: 1, 128>}, {pipeline_mode = #tpu.pipeline_mode<synchronous>, transform_indices = @transform_7, window_bounds = array<i64: 24, 128>}, {pipeline_mode = #tpu.pipeline_mode<synchronous>, transform_indices = @transform_8, window_bounds = array<i64: 24, 128>}]} {
    %c0 = arith.constant 0 : index
    %c0_0 = arith.constant 0 : index
    %0 = vector.load %arg3[%c0, %c0_0] : memref<1x128xf32, #tpu.memory_space<vmem>>, vector<1x128xf32>
    %c0_1 = arith.constant 0 : index
    %c0_2 = arith.constant 0 : index
    %1 = vector.load %arg2[%c0_1, %c0_2] : memref<24x128xf32, #tpu.memory_space<vmem>>, vector<24x128xf32>
    %2 = vector.broadcast %0 : vector<1x128xf32> to vector<24x128xf32>
    %3 = arith.addf %1, %2 : vector<24x128xf32>
    %c0_3 = arith.constant 0 : index
    %c0_4 = arith.constant 0 : index
    %4 = vector.load %arg1[%c0_3, %c0_4] : memref<24x24xf32, #tpu.memory_space<vmem>>, vector<24x24xf32>
    %cst = arith.constant dense<0.000000e+00> : vector<24x128xf32>
    %5 = tpu.matmul %4, %3, %cst {dimension_numbers = #tpu.dot_dimension_numbers<[1], [0], [0], [1], [0, 0, 1, 1], [], []>} : vector<24x24xf32>, vector<24x128xf32>, vector<24x128xf32> -> vector<24x128xf32>
    %6 = vector.broadcast %0 : vector<1x128xf32> to vector<24x128xf32>
    %7 = arith.subf %5, %6 : vector<24x128xf32>
    %c0_5 = arith.constant 0 : index
    %c0_6 = arith.constant 0 : index
    %8 = vector.load %arg8[%c0_5, %c0_6] : memref<24x128xf32, #tpu.memory_space<vmem>>, vector<24x128xf32>
    tpu.vector_store %arg8[%c0_5, %c0_6], %7 {strides = array<i32>} : memref<24x128xf32, #tpu.memory_space<vmem>>, vector<24x128xf32>,
    %c0_7 = arith.constant 0 : index
    %c0_8 = arith.constant 0 : index
    %9 = vector.load %arg4[%c0_7, %c0_8] : memref<128x128xf32, #tpu.memory_space<vmem>>, vector<128x128xf32>
    %cst_9 = arith.constant dense<0.000000e+00> : vector<24x128xf32>
    %10 = tpu.matmul %7, %9, %cst_9 {dimension_numbers = #tpu.dot_dimension_numbers<[1], [0], [0], [1], [0, 0, 1, 1], [], []>} : vector<24x128xf32>, vector<128x128xf32>, vector<24x128xf32> -> vector<24x128xf32>
    %c0_10 = arith.constant 0 : index
    %c0_11 = arith.constant 0 : index
    %11 = vector.load %arg5[%c0_10, %c0_11] : memref<1x128xf32, #tpu.memory_space<vmem>>, vector<1x128xf32>
    %12 = vector.broadcast %11 : vector<1x128xf32> to vector<24x128xf32>
    %13 = arith.addf %10, %12 : vector<24x128xf32>
    %cst_12 = arith.constant 0.000000e+00 : f32
    %14 = vector.broadcast %cst_12 : f32 to vector<24x128xf32>
    %15 = arith.maximumf %13, %14 : vector<24x128xf32>
    %c0_13 = arith.constant 0 : index
    %c0_14 = arith.constant 0 : index
    %16 = vector.load %arg6[%c0_13, %c0_14] : memref<128x128xf32, #tpu.memory_space<vmem>>, vector<128x128xf32>
    %cst_15 = arith.constant dense<0.000000e+00> : vector<24x128xf32>
    %17 = tpu.matmul %15, %16, %cst_15 {dimension_numbers = #tpu.dot_dimension_numbers<[1], [0], [0], [1], [0, 0, 1, 1], [], []>} : vector<24x128xf32>, vector<128x128xf32>, vector<24x128xf32> -> vector<24x128xf32>
    %c0_16 = arith.constant 0 : index
    %c0_17 = arith.constant 0 : index
    %18 = vector.load %arg7[%c0_16, %c0_17] : memref<1x128xf32, #tpu.memory_space<vmem>>, vector<1x128xf32>
    %19 = vector.broadcast %18 : vector<1x128xf32> to vector<24x128xf32>
    %20 = arith.addf %17, %19 : vector<24x128xf32>
    %c0_18 = arith.constant 0 : index
    %c0_19 = arith.constant 0 : index
    %21 = vector.load %arg9[%c0_18, %c0_19] : memref<24x128xf32, #tpu.memory_space<vmem>>, vector<24x128xf32>
    tpu.vector_store %arg9[%c0_18, %c0_19], %20 {strides = array<i32>} : memref<24x128xf32, #tpu.memory_space<vmem>>, vector<24x128xf32>,
    return
  }
  func.func @transform_0(%arg0: i32) -> (i32, i32) {
    %c0_i32 = arith.constant 0 : i32
    %c0_i32_0 = arith.constant 0 : i32
    %c0_i32_1 = arith.constant 0 : i32
    return %c0_i32, %c0_i32_0 : i32, i32
  }
  func.func @transform_1(%arg0: i32) -> (i32, i32) {
    %c0_i32 = arith.constant 0 : i32
    %c0_i32_0 = arith.constant 0 : i32
    %c0_i32_1 = arith.constant 0 : i32
    return %c0_i32, %c0_i32_0 : i32, i32
  }
  func.func @transform_2(%arg0: i32) -> (i32, i32) {
    %c0_i32 = arith.constant 0 : i32
    %c0_i32_0 = arith.constant 0 : i32
    %c0_i32_1 = arith.constant 0 : i32
    return %c0_i32, %c0_i32_0 : i32, i32
  }
  func.func @transform_3(%arg0: i32) -> (i32, i32) {
    %c0_i32 = arith.constant 0 : i32
    %c0_i32_0 = arith.constant 0 : i32
    %c0_i32_1 = arith.constant 0 : i32
    return %c0_i32, %c0_i32_0 : i32, i32
  }
  func.func @transform_4(%arg0: i32) -> (i32, i32) {
    %c0_i32 = arith.constant 0 : i32
    %c0_i32_0 = arith.constant 0 : i32
    %c0_i32_1 = arith.constant 0 : i32
    return %c0_i32, %c0_i32_0 : i32, i32
  }
  func.func @transform_5(%arg0: i32) -> (i32, i32) {
    %c0_i32 = arith.constant 0 : i32
    %c0_i32_0 = arith.constant 0 : i32
    %c0_i32_1 = arith.constant 0 : i32
    return %c0_i32, %c0_i32_0 : i32, i32
  }
  func.func @transform_6(%arg0: i32) -> (i32, i32) {
    %c0_i32 = arith.constant 0 : i32
    %c0_i32_0 = arith.constant 0 : i32
    %c0_i32_1 = arith.constant 0 : i32
    return %c0_i32, %c0_i32_0 : i32, i32
  }
  func.func @transform_7(%arg0: i32) -> (i32, i32) {
    %c0_i32 = arith.constant 0 : i32
    %c0_i32_0 = arith.constant 0 : i32
    %c0_i32_1 = arith.constant 0 : i32
    return %c0_i32, %c0_i32_0 : i32, i32
  }
  func.func @transform_8(%arg0: i32) -> (i32, i32) {
    %c0_i32 = arith.constant 0 : i32
    %c0_i32_0 = arith.constant 0 : i32
    %c0_i32_1 = arith.constant 0 : i32
    return %c0_i32, %c0_i32_0 : i32, i32
  }
}

</mosaic_0001>

<bundles_post_ra>
// kernel: tpu_custom_call.1
= control target key start
LH: loop header
LB: loop body
LE: loop exit
PB: predicated region body
PF: predicated region fallthrough
CT: control target
= control target key end

     0   :  { %14 = vsyncpa [#allocation3], 0  ;;  %s594_s0 = inlined_call_operand.hbm [shape: f32[24,24], index: 0, kind: input, shape index: {}]   ;;  %s595_s1 = inlined_call_operand.hbm [shape: f32[24,128], index: 1, kind: input, shape index: {}]   ;;  %s596_s2 = inlined_call_operand.vmem [shape: f32[1,128], index: 2, kind: input, shape index: {}]   ;;  %s597_s3 = inlined_call_operand.hbm [shape: f32[128,128], index: 3, kind: input, shape index: {}]   ;;  %s598_s4 = inlined_call_operand.vmem [shape: f32[1,128], index: 4, kind: input, shape index: {}]   ;;  %s599_s5 = inlined_call_operand.hbm [shape: f32[128,128], index: 5, kind: input, shape index: {}]   ;;  %s600_s6 = inlined_call_operand.vmem [shape: f32[1,128], index: 6, kind: input, shape index: {}]   ;;  %s601_s7 = inlined_call_operand.hbm [shape: f32[24,128], index: 7, kind: output, shape index: {0}]   ;;  %s602_s8 = inlined_call_operand.hbm [shape: f32[24,128], index: 8, kind: output, shape index: {1}]  }
   0x1   :  { %15 = vsyncpa [#allocation6], 0 }
   0x2   :  { %16 = vsyncpa [#allocation9], 0 }
   0x3   :  { %17 = vsyncpa [#allocation4], 0 }
   0x4   :  { %18 = vsyncpa [#allocation12], 0  ;;  %s36_s29 = sshll.u32 %s595_s1, 4  ;;  %s485_s30 = smov [#allocation5]   ;;  %s37_s29 = int_to_ptr.hbm [resolvable:$true] %s36_s29 }
   0x5   :  { %s38_s9 = sshll.u32 %s485_s30, 4  ;;  %s23_s12 = sshll.u32 %s594_s0, 4  ;;  %s39_s9 = int_to_ptr.vmem [resolvable:$true] %s38_s9  ;;  %s24_s12 = int_to_ptr.hbm [resolvable:$true] %s23_s12 }
   0x6   :  { %s486_s13 = smov 128   ;;  %s487_s14 = smov 8  }
   0x7   :  { %44 = dma.hbm_to_vmem [thread:$0]  %s37_s29, 384, %s39_s9, [#allocation6], %s486_s13, %s486_s13, %s487_s14  }
   0x8   :  { %s488_s15 = smov [#allocation2]   ;;  %s51_s1 = sshll.u32 %s597_s3, 4  ;;  %s52_s1 = int_to_ptr.hbm [resolvable:$true] %s51_s1 }
   0x9   :  { %s25_s16 = sshll.u32 %s488_s15, 4  ;;  %s66_s20 = sshll.u32 %s599_s5, 4  ;;  %s26_s16 = int_to_ptr.vmem [resolvable:$true] %s25_s16  ;;  %s67_s20 = int_to_ptr.hbm [resolvable:$true] %s66_s20 }
   0xa   :  { %31 = dma.hbm_to_vmem [thread:$0]  %s24_s12, 384, %s26_s16, [#allocation3], %s486_s13, %s486_s13, %s487_s14  }
   0xb   :  { %s489_s21 = smov [#allocation7]   ;;  %s490_s23 = smov [#allocation8]  }
   0xc   :  { %s53_s22 = sshll.u32 %s489_s21, 4  ;;  %s68_s3 = sshll.u32 %s490_s23, 4  ;;  %s54_s22 = int_to_ptr.vmem [resolvable:$true] %s53_s22  ;;  %s69_s3 = int_to_ptr.vmem [resolvable:$true] %s68_s3 }
   0xd   :  { %59 = dma.hbm_to_vmem [thread:$0]  %s52_s1, 2048, %s54_s22, [#allocation6], %s486_s13, %s486_s13, %s487_s14  }
   0xe   :  { %74 = dma.hbm_to_vmem [thread:$0]  %s67_s20, 2048, %s69_s3, [#allocation9], %s486_s13, %s486_s13, %s487_s14  }
   0xf   :  { %475 = dma.done.wait [#allocation3], 384  }
  0x10   :  { %476 = vsyncadd [#allocation3], 4294966912 }
  0x11   :  { %477 = dma.done.wait [#allocation6], 2432  }
  0x12   :  { %478 = vsyncadd [#allocation6], 4294964864 }
  0x13   :  { %479 = dma.done.wait [#allocation9], 2048  }
  0x14   :  { %480 = vsyncadd [#allocation9], 4294965248  ;;  %v96_v0 = vld [vmem:[#allocation5 + $0x10] sm:$0xff]  ;;  %v565_v1 = vld [vmem:[%s596_s2] ss:$0 sm:$0xff]  ;;  %vm106_vm0 = vcmask 195584  }
  0x15   :  { %v95_v2 = vld [vmem:[#allocation5 + $0x8] sm:$0xff]  ;;  %v94_v3 = vld [vmem:[#allocation5] sm:$0xff]  ;;  %v102_v4 = vadd.f32 %v565_v1, %v96_v0  ;;  %v163_v6 = vld [vmem:[#allocation7 + $0x78] sm:$0xff]  ;;  %s491_s26 = smov [#allocation10]   ;;  %s252_s30 = sshll.u32 %s601_s7, 4  ;;  %s253_s30 = int_to_ptr.hbm [resolvable:$true] %s252_s30 }
  0x16   :  { %v101_v5 = vadd.f32 %v565_v1, %v95_v2  ;;  %168 = vmatpush.msra.mxu1 %v163_v6  ;;  %v162_v7 = vld [vmem:[#allocation7 + $0x70] sm:$0xff]  ;;  %288 = vmatpush.msra.mxu3 %v163_v6  ;;  %v100_v8 = vadd.f32 %v565_v1, %v94_v3  ;;  %v161_v9 = vld [vmem:[#allocation7 + $0x68] sm:$0xff]  ;;  %v160_v11 = vld [vmem:[#allocation7 + $0x60] sm:$0xff]  ;;  %s250_s27 = sshll.u32 %s491_s26, 4  ;;  %s492_s10 = smov [#allocation11]   ;;  %s251_s27 = int_to_ptr.vmem [resolvable:$true] %s250_s27 }
  0x17   :  { %129 = vmatpush.msra.mxu0 %v102_v4  ;;  %v103_v10 = vld [vmem:[#allocation2] sm:$0xff]  ;;  %v159_v12 = vld [vmem:[#allocation7 + $0x58] sm:$0xff]  ;;  %v157_v14 = vld [vmem:[#allocation7 + $0x48] sm:$0xff]  ;;  %s263_s11 = sshll.u32 %s492_s10, 4  ;;  %s265_s15 = sshll.u32 %s602_s8, 4  ;;  %s264_s11 = int_to_ptr.vmem [resolvable:$true] %s263_s11  ;;  %s266_s15 = int_to_ptr.hbm [resolvable:$true] %s265_s15 }
  0x18   :  { %169 = vmatpush.msra.mxu1 %v162_v7  ;;  %289 = vmatpush.msra.mxu3 %v162_v7  ;;  %v158_v13 = vld [vmem:[#allocation7 + $0x50] sm:$0xff]  ;;  %v104_v15 = vld [vmem:[#allocation2 + $0x8] sm:$0xff]  ;;  %v156_v16 = vld [vmem:[#allocation7 + $0x40] sm:$0xff] }
  0x19   :  { %130 = vmatpush.msra.mxu0 %v101_v5  ;;  %v155_v17 = vld [vmem:[#allocation7 + $0x38] sm:$0xff]  ;;  %v154_v18 = vld [vmem:[#allocation7 + $0x30] sm:$0xff]  ;;  %v153_v19 = vld [vmem:[#allocation7 + $0x28] sm:$0xff] }
  0x1a   :  { %170 = vmatpush.msra.mxu1 %v161_v9  ;;  %290 = vmatpush.msra.mxu3 %v161_v9  ;;  %v105_v20 = vld [vmem:[#allocation2 + $0x10] sm:$0xff]  ;;  %v151_v22 = vld [vmem:[#allocation7 + $0x18] sm:$0xff]  ;;  %v150_v23 = vld [vmem:[#allocation7 + $0x10] sm:$0xff] }
  0x1b   :  { %131 = vmatpush.msra.mxu0 %v100_v8  ;;  %v152_v21 = vld [vmem:[#allocation7 + $0x20] sm:$0xff]  ;;  %v149_v24 = vld [vmem:[#allocation7 + $0x8] sm:$0xff]  ;;  %v212_v26 = vld [vmem:[#allocation8 + $0x78] sm:$0xff] }
  0x1c   :  { %285 = vmatmul.msk.f32.vlgmr.msra.gmra.mxu0 %vm106_vm0, %v103_v10  ;;  %171 = vmatpush.msra.mxu1 %v160_v11  ;;  %v148_v25 = vld [vmem:[#allocation7] sm:$0xff]  ;;  %v211_v27 = vld [vmem:[#allocation8 + $0x70] sm:$0xff]  ;;  %v210_v28 = vld [vmem:[#allocation8 + $0x68] sm:$0xff] }
  0x1d   :  { %291 = vmatpush.msra.mxu3 %v160_v11  ;;  %217 = vmatpush.msrb.mxu0 %v212_v26  ;;  %v209_v29 = vld [vmem:[#allocation8 + $0x60] sm:$0xff]  ;;  %v208_v30 = vld [vmem:[#allocation8 + $0x58] sm:$0xff]  ;;  %v207_v31 = vld [vmem:[#allocation8 + $0x50] sm:$0xff] }
  0x1e   :  { %172 = vmatpush.msra.mxu1 %v159_v12  ;;  %304 = vmatpush.msra.mxu2 %v212_v26  ;;  %v206_v32 = vld [vmem:[#allocation8 + $0x48] sm:$0xff]  ;;  %v205_v33 = vld [vmem:[#allocation8 + $0x40] sm:$0xff]  ;;  %v204_v36 = vld [vmem:[#allocation8 + $0x38] sm:$0xff] }
  0x1f   :  { %292 = vmatpush.msra.mxu3 %v159_v12  ;;  %218 = vmatpush.msrb.mxu0 %v211_v27  ;;  %v203_v37 = vld [vmem:[#allocation8 + $0x30] sm:$0xff]  ;;  %v202_v38 = vld [vmem:[#allocation8 + $0x28] sm:$0xff]  ;;  %v201_v39 = vld [vmem:[#allocation8 + $0x20] sm:$0xff] }
  0x20   :  { %173 = vmatpush.msra.mxu1 %v158_v13  ;;  %305 = vmatpush.msra.mxu2 %v211_v27  ;;  %v200_v42 = vld [vmem:[#allocation8 + $0x18] sm:$0xff]  ;;  %v199_v45 = vld [vmem:[#allocation8 + $0x10] sm:$0xff]  ;;  %v198_v46 = vld [vmem:[#allocation8 + $0x8] sm:$0xff] }
  0x21   :  { %293 = vmatpush.msra.mxu3 %v158_v13  ;;  %219 = vmatpush.msrb.mxu0 %v210_v28  ;;  %v197_v47 = vld [vmem:[#allocation8] sm:$0xff]  ;;  %v329_v48 = vld [vmem:[%s598_s4] ss:$0 sm:$0xff] }
  0x22   :  { %174 = vmatpush.msra.mxu1 %v157_v14  ;;  %306 = vmatpush.msra.mxu2 %v210_v28  ;;  %v330_v58 = vld [vmem:[%s600_s6] ss:$0 sm:$0xff] }
  0x23   :  { %294 = vmatpush.msra.mxu3 %v157_v14  ;;  %220 = vmatpush.msrb.mxu0 %v209_v29 }
  0x24   :  { %286 = vmatmul.msk.f32.gmra.mxu0 %vm106_vm0, %v104_v15  ;;  %175 = vmatpush.msra.mxu1 %v156_v16 }
  0x25   :  { %295 = vmatpush.msra.mxu3 %v156_v16  ;;  %307 = vmatpush.msra.mxu2 %v209_v29 }
  0x26   :  { %176 = vmatpush.msra.mxu1 %v155_v17  ;;  %221 = vmatpush.msrb.mxu0 %v208_v30 }
  0x27   :  { %296 = vmatpush.msra.mxu3 %v155_v17  ;;  %308 = vmatpush.msra.mxu2 %v208_v30 }
  0x28   :  { %177 = vmatpush.msra.mxu1 %v154_v18  ;;  %222 = vmatpush.msrb.mxu0 %v207_v31 }
  0x29   :  { %297 = vmatpush.msra.mxu3 %v154_v18  ;;  %309 = vmatpush.msra.mxu2 %v207_v31 }
  0x2a   :  { %178 = vmatpush.msra.mxu1 %v153_v19  ;;  %223 = vmatpush.msrb.mxu0 %v206_v32 }
  0x2b   :  { %298 = vmatpush.msra.mxu3 %v153_v19  ;;  %310 = vmatpush.msra.mxu2 %v206_v32 }
  0x2c   :  { %287 = vmatmul.msk.f32.gmra.mxu0 %vm106_vm0, %v105_v20  ;;  %179 = vmatpush.msra.mxu1 %v152_v21 }
  0x2d   :  { %299 = vmatpush.msra.mxu3 %v152_v21  ;;  %224 = vmatpush.msrb.mxu0 %v205_v33 }
  0x2e   :  { %180 = vmatpush.msra.mxu1 %v151_v22  ;;  %311 = vmatpush.msra.mxu2 %v205_v33 }
  0x2f   :  { %300 = vmatpush.msra.mxu3 %v151_v22  ;;  %225 = vmatpush.msrb.mxu0 %v204_v36 }
  0x30   :  { %181 = vmatpush.msra.mxu1 %v150_v23  ;;  %312 = vmatpush.msra.mxu2 %v204_v36 }
  0x31   :  { %301 = vmatpush.msra.mxu3 %v150_v23  ;;  %226 = vmatpush.msrb.mxu0 %v203_v37 }
  0x32   :  { %182 = vmatpush.msra.mxu1 %v149_v24  ;;  %313 = vmatpush.msra.mxu2 %v203_v37 }
  0x33   :  { %302 = vmatpush.msra.mxu3 %v149_v24  ;;  %227 = vmatpush.msrb.mxu0 %v202_v38 }
  0x34   :  { %183 = vmatpush.msra.mxu1 %v148_v25  ;;  %314 = vmatpush.msra.mxu2 %v202_v38 }
  0x35   :  { %303 = vmatpush.msra.mxu3 %v148_v25  ;;  %228 = vmatpush.msrb.mxu0 %v201_v39 }
  0x36   :  { %315 = vmatpush.msra.mxu2 %v201_v39 }
  0x37   :  { %229 = vmatpush.msrb.mxu0 %v200_v42 }
  0x38   :  { %316 = vmatpush.msra.mxu2 %v200_v42 }
  0x39   :  { %230 = vmatpush.msrb.mxu0 %v199_v45 }
  0x3a   :  { %317 = vmatpush.msra.mxu2 %v199_v45 }
  0x3b   :  { %231 = vmatpush.msrb.mxu0 %v198_v46 }
  0x3c   :  { %318 = vmatpush.msra.mxu2 %v198_v46 }
  0x3d   :  { %232 = vmatpush.msrb.mxu0 %v197_v47 }
  0x3e   :  { %319 = vmatpush.msra.mxu2 %v197_v47 }
  0x99   :  { %v133_v34 = vpop.f32.mrf.mxu0 }
  0x9a   :  { %v142_v35 = vsub.f32 %v133_v34, %v565_v1 }
  0x9c   :  { %145 = vst [vmem:[#allocation10] sm:$0xff] %v142_v35  ;;  %184 = vmatmul.f32.vlgmr.msra.gmra.mxu1 %v142_v35 }
  0xa1   :  { %v136_v40 = vpop.f32.mrf.mxu0 }
  0xa2   :  { %v143_v41 = vsub.f32 %v136_v40, %v565_v1 }
  0xa4   :  { %146 = vst [vmem:[#allocation10 + $0x8] sm:$0xff] %v143_v41  ;;  %187 = vmatmul.f32.vlgmr.msra.gmra.mxu3 %v143_v41 }
  0xa9   :  { %v139_v43 = vpop.f32.mrf.mxu0 }
  0xaa   :  { %v144_v44 = vsub.f32 %v139_v43, %v565_v1 }
  0xac   :  { %147 = vst [vmem:[#allocation10 + $0x10] sm:$0xff] %v144_v44  ;;  %190 = vmatmul.f32.gmra.mxu3 %v144_v44 }
  0xad   :  { %258 = dma.vmem_to_hbm [thread:$0]  %s251_s27, 384, %s253_s30, [#allocation4], %s486_s13, %s486_s13, %s487_s14  }
 0x119   :  { %v185_v49 = vpop.f32.mrf.mxu1 }
 0x11a   :  { %v186_v50 = vadd.f32 %v329_v48, %v185_v49 }
 0x11c   :  { %v194_v51 = vmax.f32 %v186_v50, 0.0 }
 0x11e   :  { %233 = vmatmul.f32.vlgmr.msrb.gmra.mxu0 %v194_v51 }
 0x127   :  { %v188_v52 = vpop.f32.mrf.mxu3 }
 0x128   :  { %v189_v53 = vadd.f32 %v329_v48, %v188_v52 }
 0x12a   :  { %v195_v54 = vmax.f32 %v189_v53, 0.0 }
 0x12c   :  { %236 = vmatmul.f32.vlgmr.msra.gmra.mxu2 %v195_v54 }
 0x12f   :  { %v191_v55 = vpop.f32.mrf.mxu3 }
 0x130   :  { %v192_v56 = vadd.f32 %v329_v48, %v191_v55 }
 0x132   :  { %v196_v57 = vmax.f32 %v192_v56, 0.0 }
 0x134   :  { %239 = vmatmul.f32.gmra.mxu2 %v196_v57 }
 0x19b   :  { %v234_v59 = vpop.f32.mrf.mxu0 }
 0x19c   :  { %v235_v60 = vadd.f32 %v330_v58, %v234_v59 }
 0x19e   :  { %243 = vst [vmem:[#allocation11] sm:$0xff] %v235_v60 }
 0x1af   :  { %v237_v61 = vpop.f32.mrf.mxu2 }
 0x1b0   :  { %v238_v62 = vadd.f32 %v330_v58, %v237_v61 }
 0x1b2   :  { %244 = vst [vmem:[#allocation11 + $0x8] sm:$0xff] %v238_v62 }
 0x1b7   :  { %v240_v63 = vpop.f32.mrf.mxu2 }
 0x1b8   :  { %v241_v0 = vadd.f32 %v330_v58, %v240_v63 }
 0x1ba   :  { %245 = vst [vmem:[#allocation11 + $0x10] sm:$0xff] %v241_v0 }
 0x1bb   :  { %271 = dma.vmem_to_hbm [thread:$0]  %s264_s11, 384, %s266_s15, [#allocation12], %s486_s13, %s486_s13, %s487_s14  }
 0x1bc   :  { %481 = dma.done.wait [#allocation4], 384  }
 0x1bd   :  { %482 = vsyncadd [#allocation4], 4294966912 }
 0x1be   :  { %483 = dma.done.wait [#allocation12], 384  }
 0x1bf   :  { %484 = vsyncadd [#allocation12], 4294966912 }
 0x1c0   :  { %280 = vsyncpa [#allocation3], 1 }
 0x1c1   :  { %281 = vsyncpa [#allocation6], 1 }
 0x1c2   :  { %282 = vsyncpa [#allocation9], 1 }
 0x1c3   :  { %283 = vsyncpa [#allocation4], 1 }
 0x1c4   :  { %284 = vsyncpa [#allocation12], 1 }

</bundles_post_ra>
